<compile_context>
chip_gen: v7x
topology: tpu7x:2x2x1
jax: 0.10.0
libtpu: 0.0.40
codegen_flags: <defaults>
</compile_context>

<pallas_src>
import jax
import jax.numpy as jnp
from jax.experimental import pallas as pl
from jax.experimental.pallas import tpu as pltpu


def _make_lstm_kernel(T, N, D, H):
    """Build the kernel with static shape constants closed over."""

    def kernel(x_ref, wih_ref, whh_ref, b_ref, wfc_ref, bfc_ref, out_ref):
        # ---- hoisted, lane-dense input projection for all T steps at once ----
        # (T*N, D) @ (D, 4H) + (1, 4H)  ->  (T*N, 4H); single MXU pass.
        xp = (jnp.dot(x_ref[...], wih_ref[...],
                      preferred_element_type=jnp.float32)
              + b_ref[...])

        # ---- weights loaded once, reused every step ----
        whh = whh_ref[...]          # (H, 4H) recurrent weights, gate-packed
        wfc = wfc_ref[...]          # (1, H) lane-dense FC row

        h = jnp.zeros((N, H), jnp.float32)
        c = jnp.zeros((N, H), jnp.float32)

        # ---- serial recurrence, fully unrolled (T small & static) ----
        for t in range(T):
            # One recurrent MXU push per step; PyTorch gate order i, f, g, o
            # packed along the lane axis (4H).
            z = xp[t * N:(t + 1) * N, :] + jnp.dot(
                h, whh, preferred_element_type=jnp.float32)   # (N, 4H)

            # Full-lane EUP passes, then static lane slices per gate.
            sig = jax.nn.sigmoid(z)
            tnh = jnp.tanh(z)
            i_g = sig[:, 0 * H:1 * H]
            f_g = sig[:, 1 * H:2 * H]
            g_g = tnh[:, 2 * H:3 * H]
            o_g = sig[:, 3 * H:4 * H]

            c = f_g * c + i_g * g_g
            h = o_g * jnp.tanh(c)

        # dropout1d(p=0.0) is identity; ReLU; FC(H -> 1) as multiply + reduce.
        relu_h = jnp.maximum(h, 0.0)                          # (N, H)
        out_ref[...] = (jnp.sum(relu_h * wfc, axis=-1, keepdims=True)
                        + bfc_ref[0])                         # (N, 1)

    return kernel


def lstm_simple_net_forward(x_btd, w_ih, w_hh, b_ih, b_hh, w_fc, b_fc):
    """x_btd: (N, T, D) batch-first, as in the PyTorch module's forward().
    Weights are PyTorch-layout: w_ih (4H, D), w_hh (4H, H), b_* (4H,),
    w_fc (1, H), b_fc (1,).  Returns (N, 1)."""
    N, T, D = x_btd.shape
    H4 = w_ih.shape[0]
    H = H4 // 4

    # Plain-JAX glue: time-major flatten of x, right-multiply weight layout,
    # bias folding.  PyTorch gate order (i, f, g, o) preserved along 4H.
    x_tm = jnp.transpose(x_btd, (1, 0, 2)).reshape(T * N, D).astype(jnp.float32)
    wih_cat = jnp.transpose(w_ih).astype(jnp.float32)        # (D, 4H)
    whh_cat = jnp.transpose(w_hh).astype(jnp.float32)        # (H, 4H)
    b_cat = (b_ih + b_hh).reshape(1, 4 * H).astype(jnp.float32)  # (1, 4H)
    wfc = w_fc.reshape(1, H).astype(jnp.float32)             # (1, H)
    bfc = b_fc.reshape(1).astype(jnp.float32)                # (1,) scalar

    kernel = _make_lstm_kernel(T, N, D, H)

    out = pl.pallas_call(
        kernel,
        out_shape=jax.ShapeDtypeStruct((N, 1), jnp.float32),
        in_specs=[
            pl.BlockSpec(memory_space=pltpu.MemorySpace.VMEM),  # x (T*N, D)
            pl.BlockSpec(memory_space=pltpu.MemorySpace.VMEM),  # W_ih (D, 4H)
            pl.BlockSpec(memory_space=pltpu.MemorySpace.VMEM),  # W_hh (H, 4H)
            pl.BlockSpec(memory_space=pltpu.MemorySpace.VMEM),  # bias (1, 4H)
            pl.BlockSpec(memory_space=pltpu.MemorySpace.VMEM),  # W_fc (1, H)
            pl.BlockSpec(memory_space=pltpu.MemorySpace.SMEM),  # b_fc scalar
        ],
        out_specs=pl.BlockSpec(memory_space=pltpu.MemorySpace.VMEM),
    )(x_tm, wih_cat, whh_cat, b_cat, wfc, bfc)
    return out


def _reference_forward(x_btd, w_ih, w_hh, b_ih, b_hh, w_fc, b_fc):
    """Pure-JAX reference matching torch.nn.LSTM + the module's forward()."""
    N, T, D = x_btd.shape
    H = w_hh.shape[1]
    x_tnd = jnp.transpose(x_btd, (1, 0, 2))
    h = jnp.zeros((N, H), jnp.float32)
    c = jnp.zeros((N, H), jnp.float32)
    for t in range(T):
        gates = x_tnd[t] @ w_ih.T + h @ w_hh.T + b_ih + b_hh
        i_g = jax.nn.sigmoid(gates[:, 0 * H:1 * H])
        f_g = jax.nn.sigmoid(gates[:, 1 * H:2 * H])
        g_g = jnp.tanh(gates[:, 2 * H:3 * H])
        o_g = jax.nn.sigmoid(gates[:, 3 * H:4 * H])
        c = f_g * c + i_g * g_g
        h = o_g * jnp.tanh(c)
    return jnp.maximum(h, 0.0) @ w_fc.T + b_fc


if __name__ == "__main__":
    # Small shapes consistent with the module: batch=2, seq=8, dim_input=4,
    # dim_recurrent (hidden) = 32.
    N, T, D, H = 2, 8, 4, 32

    key = jax.random.PRNGKey(0)
    kx, k1, k2, k3, k4, k5, k6 = jax.random.split(key, 7)

    # Deterministic parameter init, PyTorch-style uniform(-1/sqrt(H), 1/sqrt(H)).
    s = 1.0 / jnp.sqrt(jnp.float32(H))
    x = jax.random.normal(kx, (N, T, D), jnp.float32)
    w_ih = jax.random.uniform(k1, (4 * H, D), jnp.float32, -s, s)
    w_hh = jax.random.uniform(k2, (4 * H, H), jnp.float32, -s, s)
    b_ih = jax.random.uniform(k3, (4 * H,), jnp.float32, -s, s)
    b_hh = jax.random.uniform(k4, (4 * H,), jnp.float32, -s, s)
    w_fc = jax.random.uniform(k5, (1, H), jnp.float32, -s, s)
    b_fc = jax.random.uniform(k6, (1,), jnp.float32, -s, s)

    out = lstm_simple_net_forward(x, w_ih, w_hh, b_ih, b_hh, w_fc, b_fc)
    out = jax.block_until_ready(out)

    ref = _reference_forward(x, w_ih, w_hh, b_ih, b_hh, w_fc, b_fc)
    assert out.shape == (N, 1), out.shape
    assert jnp.allclose(out, ref, atol=2e-5, rtol=1e-5), (out, ref)

    print("KERNEL_OK")
</pallas_src>

<mosaic_0001>
module attributes {stable_mosaic.version = 11 : i64} {
  func.func @kernel(%arg0: memref<16x4xf32, #tpu.memory_space<vmem>>, %arg1: memref<4x128xf32, #tpu.memory_space<vmem>>, %arg2: memref<32x128xf32, #tpu.memory_space<vmem>>, %arg3: memref<1x128xf32, #tpu.memory_space<vmem>>, %arg4: memref<1x32xf32, #tpu.memory_space<vmem>>, %arg5: memref<1xf32, #tpu.memory_space<smem>>, %arg6: memref<2x1xf32, #tpu.memory_space<vmem>>) attributes {dimension_semantics = [], scalar_prefetch = 0 : i64, scratch_operands = 0 : i64, tpu.core_type = #tpu.core_type<tc>} {
    %c0 = arith.constant 0 : index
    %c0_0 = arith.constant 0 : index
    %0 = vector.load %arg0[%c0, %c0_0] : memref<16x4xf32, #tpu.memory_space<vmem>>, vector<16x4xf32>
    %c0_1 = arith.constant 0 : index
    %c0_2 = arith.constant 0 : index
    %1 = vector.load %arg1[%c0_1, %c0_2] : memref<4x128xf32, #tpu.memory_space<vmem>>, vector<4x128xf32>
    %cst = arith.constant dense<0.000000e+00> : vector<16x128xf32>
    %2 = tpu.matmul %0, %1, %cst {dimension_numbers = #tpu.dot_dimension_numbers<[1], [0], [0], [1], [0, 0, 1, 1], [], []>} : vector<16x4xf32>, vector<4x128xf32>, vector<16x128xf32> -> vector<16x128xf32>
    %c0_3 = arith.constant 0 : index
    %c0_4 = arith.constant 0 : index
    %3 = vector.load %arg3[%c0_3, %c0_4] : memref<1x128xf32, #tpu.memory_space<vmem>>, vector<1x128xf32>
    %4 = vector.broadcast %3 : vector<1x128xf32> to vector<16x128xf32>
    %5 = arith.addf %2, %4 : vector<16x128xf32>
    %c0_5 = arith.constant 0 : index
    %c0_6 = arith.constant 0 : index
    %6 = vector.load %arg2[%c0_5, %c0_6] : memref<32x128xf32, #tpu.memory_space<vmem>>, vector<32x128xf32>
    %c0_7 = arith.constant 0 : index
    %c0_8 = arith.constant 0 : index
    %7 = vector.load %arg4[%c0_7, %c0_8] : memref<1x32xf32, #tpu.memory_space<vmem>>, vector<1x32xf32>
    %cst_9 = arith.constant 0.000000e+00 : f32
    %8 = vector.broadcast %cst_9 : f32 to vector<2x32xf32>
    %cst_10 = arith.constant 0.000000e+00 : f32
    %9 = vector.broadcast %cst_10 : f32 to vector<2x32xf32>
    %10 = vector.extract_strided_slice %5 {offsets = [0, 0], sizes = [2, 128], strides = [1, 1]} : vector<16x128xf32> to vector<2x128xf32>
    %cst_11 = arith.constant dense<0.000000e+00> : vector<2x128xf32>
    %11 = tpu.matmul %8, %6, %cst_11 {dimension_numbers = #tpu.dot_dimension_numbers<[1], [0], [0], [1], [0, 0, 1, 1], [], []>} : vector<2x32xf32>, vector<32x128xf32>, vector<2x128xf32> -> vector<2x128xf32>
    %12 = arith.addf %10, %11 : vector<2x128xf32>
    %13 = arith.negf %12 : vector<2x128xf32>
    %14 = math.exp %13 : vector<2x128xf32>
    %cst_12 = arith.constant 1.000000e+00 : f32
    %15 = vector.broadcast %cst_12 : f32 to vector<2x128xf32>
    %16 = arith.addf %15, %14 : vector<2x128xf32>
    %17 = arith.divf %15, %16 : vector<2x128xf32>
    %18 = math.tanh %12 : vector<2x128xf32>
    %19 = vector.extract_strided_slice %17 {offsets = [0, 0], sizes = [2, 32], strides = [1, 1]} : vector<2x128xf32> to vector<2x32xf32>
    %20 = vector.extract_strided_slice %17 {offsets = [0, 32], sizes = [2, 32], strides = [1, 1]} : vector<2x128xf32> to vector<2x32xf32>
    %21 = vector.extract_strided_slice %18 {offsets = [0, 64], sizes = [2, 32], strides = [1, 1]} : vector<2x128xf32> to vector<2x32xf32>
    %22 = vector.extract_strided_slice %17 {offsets = [0, 96], sizes = [2, 32], strides = [1, 1]} : vector<2x128xf32> to vector<2x32xf32>
    %23 = arith.mulf %20, %9 : vector<2x32xf32>
    %24 = arith.mulf %19, %21 : vector<2x32xf32>
    %25 = arith.addf %23, %24 : vector<2x32xf32>
    %26 = math.tanh %25 : vector<2x32xf32>
    %27 = arith.mulf %22, %26 : vector<2x32xf32>
    %28 = vector.extract_strided_slice %5 {offsets = [2, 0], sizes = [2, 128], strides = [1, 1]} : vector<16x128xf32> to vector<2x128xf32>
    %cst_13 = arith.constant dense<0.000000e+00> : vector<2x128xf32>
    %29 = tpu.matmul %27, %6, %cst_13 {dimension_numbers = #tpu.dot_dimension_numbers<[1], [0], [0], [1], [0, 0, 1, 1], [], []>} : vector<2x32xf32>, vector<32x128xf32>, vector<2x128xf32> -> vector<2x128xf32>
    %30 = arith.addf %28, %29 : vector<2x128xf32>
    %31 = arith.negf %30 : vector<2x128xf32>
    %32 = math.exp %31 : vector<2x128xf32>
    %cst_14 = arith.constant 1.000000e+00 : f32
    %33 = vector.broadcast %cst_14 : f32 to vector<2x128xf32>
    %34 = arith.addf %33, %32 : vector<2x128xf32>
    %35 = arith.divf %33, %34 : vector<2x128xf32>
    %36 = math.tanh %30 : vector<2x128xf32>
    %37 = vector.extract_strided_slice %35 {offsets = [0, 0], sizes = [2, 32], strides = [1, 1]} : vector<2x128xf32> to vector<2x32xf32>
    %38 = vector.extract_strided_slice %35 {offsets = [0, 32], sizes = [2, 32], strides = [1, 1]} : vector<2x128xf32> to vector<2x32xf32>
    %39 = vector.extract_strided_slice %36 {offsets = [0, 64], sizes = [2, 32], strides = [1, 1]} : vector<2x128xf32> to vector<2x32xf32>
    %40 = vector.extract_strided_slice %35 {offsets = [0, 96], sizes = [2, 32], strides = [1, 1]} : vector<2x128xf32> to vector<2x32xf32>
    %41 = arith.mulf %38, %25 : vector<2x32xf32>
    %42 = arith.mulf %37, %39 : vector<2x32xf32>
    %43 = arith.addf %41, %42 : vector<2x32xf32>
    %44 = math.tanh %43 : vector<2x32xf32>
    %45 = arith.mulf %40, %44 : vector<2x32xf32>
    %46 = vector.extract_strided_slice %5 {offsets = [4, 0], sizes = [2, 128], strides = [1, 1]} : vector<16x128xf32> to vector<2x128xf32>
    %cst_15 = arith.constant dense<0.000000e+00> : vector<2x128xf32>
    %47 = tpu.matmul %45, %6, %cst_15 {dimension_numbers = #tpu.dot_dimension_numbers<[1], [0], [0], [1], [0, 0, 1, 1], [], []>} : vector<2x32xf32>, vector<32x128xf32>, vector<2x128xf32> -> vector<2x128xf32>
    %48 = arith.addf %46, %47 : vector<2x128xf32>
    %49 = arith.negf %48 : vector<2x128xf32>
    %50 = math.exp %49 : vector<2x128xf32>
    %cst_16 = arith.constant 1.000000e+00 : f32
    %51 = vector.broadcast %cst_16 : f32 to vector<2x128xf32>
    %52 = arith.addf %51, %50 : vector<2x128xf32>
    %53 = arith.divf %51, %52 : vector<2x128xf32>
    %54 = math.tanh %48 : vector<2x128xf32>
    %55 = vector.extract_strided_slice %53 {offsets = [0, 0], sizes = [2, 32], strides = [1, 1]} : vector<2x128xf32> to vector<2x32xf32>
    %56 = vector.extract_strided_slice %53 {offsets = [0, 32], sizes = [2, 32], strides = [1, 1]} : vector<2x128xf32> to vector<2x32xf32>
    %57 = vector.extract_strided_slice %54 {offsets = [0, 64], sizes = [2, 32], strides = [1, 1]} : vector<2x128xf32> to vector<2x32xf32>
    %58 = vector.extract_strided_slice %53 {offsets = [0, 96], sizes = [2, 32], strides = [1, 1]} : vector<2x128xf32> to vector<2x32xf32>
    %59 = arith.mulf %56, %43 : vector<2x32xf32>
    %60 = arith.mulf %55, %57 : vector<2x32xf32>
    %61 = arith.addf %59, %60 : vector<2x32xf32>
    %62 = math.tanh %61 : vector<2x32xf32>
    %63 = arith.mulf %58, %62 : vector<2x32xf32>
    %64 = vector.extract_strided_slice %5 {offsets = [6, 0], sizes = [2, 128], strides = [1, 1]} : vector<16x128xf32> to vector<2x128xf32>
    %cst_17 = arith.constant dense<0.000000e+00> : vector<2x128xf32>
    %65 = tpu.matmul %63, %6, %cst_17 {dimension_numbers = #tpu.dot_dimension_numbers<[1], [0], [0], [1], [0, 0, 1, 1], [], []>} : vector<2x32xf32>, vector<32x128xf32>, vector<2x128xf32> -> vector<2x128xf32>
    %66 = arith.addf %64, %65 : vector<2x128xf32>
    %67 = arith.negf %66 : vector<2x128xf32>
    %68 = math.exp %67 : vector<2x128xf32>
    %cst_18 = arith.constant 1.000000e+00 : f32
    %69 = vector.broadcast %cst_18 : f32 to vector<2x128xf32>
    %70 = arith.addf %69, %68 : vector<2x128xf32>
    %71 = arith.divf %69, %70 : vector<2x128xf32>
    %72 = math.tanh %66 : vector<2x128xf32>
    %73 = vector.extract_strided_slice %71 {offsets = [0, 0], sizes = [2, 32], strides = [1, 1]} : vector<2x128xf32> to vector<2x32xf32>
    %74 = vector.extract_strided_slice %71 {offsets = [0, 32], sizes = [2, 32], strides = [1, 1]} : vector<2x128xf32> to vector<2x32xf32>
    %75 = vector.extract_strided_slice %72 {offsets = [0, 64], sizes = [2, 32], strides = [1, 1]} : vector<2x128xf32> to vector<2x32xf32>
    %76 = vector.extract_strided_slice %71 {offsets = [0, 96], sizes = [2, 32], strides = [1, 1]} : vector<2x128xf32> to vector<2x32xf32>
    %77 = arith.mulf %74, %61 : vector<2x32xf32>
    %78 = arith.mulf %73, %75 : vector<2x32xf32>
    %79 = arith.addf %77, %78 : vector<2x32xf32>
    %80 = math.tanh %79 : vector<2x32xf32>
    %81 = arith.mulf %76, %80 : vector<2x32xf32>
    %82 = vector.extract_strided_slice %5 {offsets = [8, 0], sizes = [2, 128], strides = [1, 1]} : vector<16x128xf32> to vector<2x128xf32>
    %cst_19 = arith.constant dense<0.000000e+00> : vector<2x128xf32>
    %83 = tpu.matmul %81, %6, %cst_19 {dimension_numbers = #tpu.dot_dimension_numbers<[1], [0], [0], [1], [0, 0, 1, 1], [], []>} : vector<2x32xf32>, vector<32x128xf32>, vector<2x128xf32> -> vector<2x128xf32>
    %84 = arith.addf %82, %83 : vector<2x128xf32>
    %85 = arith.negf %84 : vector<2x128xf32>
    %86 = math.exp %85 : vector<2x128xf32>
    %cst_20 = arith.constant 1.000000e+00 : f32
    %87 = vector.broadcast %cst_20 : f32 to vector<2x128xf32>
    %88 = arith.addf %87, %86 : vector<2x128xf32>
    %89 = arith.divf %87, %88 : vector<2x128xf32>
    %90 = math.tanh %84 : vector<2x128xf32>
    %91 = vector.extract_strided_slice %89 {offsets = [0, 0], sizes = [2, 32], strides = [1, 1]} : vector<2x128xf32> to vector<2x32xf32>
    %92 = vector.extract_strided_slice %89 {offsets = [0, 32], sizes = [2, 32], strides = [1, 1]} : vector<2x128xf32> to vector<2x32xf32>
    %93 = vector.extract_strided_slice %90 {offsets = [0, 64], sizes = [2, 32], strides = [1, 1]} : vector<2x128xf32> to vector<2x32xf32>
    %94 = vector.extract_strided_slice %89 {offsets = [0, 96], sizes = [2, 32], strides = [1, 1]} : vector<2x128xf32> to vector<2x32xf32>
    %95 = arith.mulf %92, %79 : vector<2x32xf32>
    %96 = arith.mulf %91, %93 : vector<2x32xf32>
    %97 = arith.addf %95, %96 : vector<2x32xf32>
    %98 = math.tanh %97 : vector<2x32xf32>
    %99 = arith.mulf %94, %98 : vector<2x32xf32>
    %100 = vector.extract_strided_slice %5 {offsets = [10, 0], sizes = [2, 128], strides = [1, 1]} : vector<16x128xf32> to vector<2x128xf32>
    %cst_21 = arith.constant dense<0.000000e+00> : vector<2x128xf32>
    %101 = tpu.matmul %99, %6, %cst_21 {dimension_numbers = #tpu.dot_dimension_numbers<[1], [0], [0], [1], [0, 0, 1, 1], [], []>} : vector<2x32xf32>, vector<32x128xf32>, vector<2x128xf32> -> vector<2x128xf32>
    %102 = arith.addf %100, %101 : vector<2x128xf32>
    %103 = arith.negf %102 : vector<2x128xf32>
    %104 = math.exp %103 : vector<2x128xf32>
    %cst_22 = arith.constant 1.000000e+00 : f32
    %105 = vector.broadcast %cst_22 : f32 to vector<2x128xf32>
    %106 = arith.addf %105, %104 : vector<2x128xf32>
    %107 = arith.divf %105, %106 : vector<2x128xf32>
    %108 = math.tanh %102 : vector<2x128xf32>
    %109 = vector.extract_strided_slice %107 {offsets = [0, 0], sizes = [2, 32], strides = [1, 1]} : vector<2x128xf32> to vector<2x32xf32>
    %110 = vector.extract_strided_slice %107 {offsets = [0, 32], sizes = [2, 32], strides = [1, 1]} : vector<2x128xf32> to vector<2x32xf32>
    %111 = vector.extract_strided_slice %108 {offsets = [0, 64], sizes = [2, 32], strides = [1, 1]} : vector<2x128xf32> to vector<2x32xf32>
    %112 = vector.extract_strided_slice %107 {offsets = [0, 96], sizes = [2, 32], strides = [1, 1]} : vector<2x128xf32> to vector<2x32xf32>
    %113 = arith.mulf %110, %97 : vector<2x32xf32>
    %114 = arith.mulf %109, %111 : vector<2x32xf32>
    %115 = arith.addf %113, %114 : vector<2x32xf32>
    %116 = math.tanh %115 : vector<2x32xf32>
    %117 = arith.mulf %112, %116 : vector<2x32xf32>
    %118 = vector.extract_strided_slice %5 {offsets = [12, 0], sizes = [2, 128], strides = [1, 1]} : vector<16x128xf32> to vector<2x128xf32>
    %cst_23 = arith.constant dense<0.000000e+00> : vector<2x128xf32>
    %119 = tpu.matmul %117, %6, %cst_23 {dimension_numbers = #tpu.dot_dimension_numbers<[1], [0], [0], [1], [0, 0, 1, 1], [], []>} : vector<2x32xf32>, vector<32x128xf32>, vector<2x128xf32> -> vector<2x128xf32>
    %120 = arith.addf %118, %119 : vector<2x128xf32>
    %121 = arith.negf %120 : vector<2x128xf32>
    %122 = math.exp %121 : vector<2x128xf32>
    %cst_24 = arith.constant 1.000000e+00 : f32
    %123 = vector.broadcast %cst_24 : f32 to vector<2x128xf32>
    %124 = arith.addf %123, %122 : vector<2x128xf32>
    %125 = arith.divf %123, %124 : vector<2x128xf32>
    %126 = math.tanh %120 : vector<2x128xf32>
    %127 = vector.extract_strided_slice %125 {offsets = [0, 0], sizes = [2, 32], strides = [1, 1]} : vector<2x128xf32> to vector<2x32xf32>
    %128 = vector.extract_strided_slice %125 {offsets = [0, 32], sizes = [2, 32], strides = [1, 1]} : vector<2x128xf32> to vector<2x32xf32>
    %129 = vector.extract_strided_slice %126 {offsets = [0, 64], sizes = [2, 32], strides = [1, 1]} : vector<2x128xf32> to vector<2x32xf32>
    %130 = vector.extract_strided_slice %125 {offsets = [0, 96], sizes = [2, 32], strides = [1, 1]} : vector<2x128xf32> to vector<2x32xf32>
    %131 = arith.mulf %128, %115 : vector<2x32xf32>
    %132 = arith.mulf %127, %129 : vector<2x32xf32>
    %133 = arith.addf %131, %132 : vector<2x32xf32>
    %134 = math.tanh %133 : vector<2x32xf32>
    %135 = arith.mulf %130, %134 : vector<2x32xf32>
    %136 = vector.extract_strided_slice %5 {offsets = [14, 0], sizes = [2, 128], strides = [1, 1]} : vector<16x128xf32> to vector<2x128xf32>
    %cst_25 = arith.constant dense<0.000000e+00> : vector<2x128xf32>
    %137 = tpu.matmul %135, %6, %cst_25 {dimension_numbers = #tpu.dot_dimension_numbers<[1], [0], [0], [1], [0, 0, 1, 1], [], []>} : vector<2x32xf32>, vector<32x128xf32>, vector<2x128xf32> -> vector<2x128xf32>
    %138 = arith.addf %136, %137 : vector<2x128xf32>
    %139 = arith.negf %138 : vector<2x128xf32>
    %140 = math.exp %139 : vector<2x128xf32>
    %cst_26 = arith.constant 1.000000e+00 : f32
    %141 = vector.broadcast %cst_26 : f32 to vector<2x128xf32>
    %142 = arith.addf %141, %140 : vector<2x128xf32>
    %143 = arith.divf %141, %142 : vector<2x128xf32>
    %144 = math.tanh %138 : vector<2x128xf32>
    %145 = vector.extract_strided_slice %143 {offsets = [0, 0], sizes = [2, 32], strides = [1, 1]} : vector<2x128xf32> to vector<2x32xf32>
    %146 = vector.extract_strided_slice %143 {offsets = [0, 32], sizes = [2, 32], strides = [1, 1]} : vector<2x128xf32> to vector<2x32xf32>
    %147 = vector.extract_strided_slice %144 {offsets = [0, 64], sizes = [2, 32], strides = [1, 1]} : vector<2x128xf32> to vector<2x32xf32>
    %148 = vector.extract_strided_slice %143 {offsets = [0, 96], sizes = [2, 32], strides = [1, 1]} : vector<2x128xf32> to vector<2x32xf32>
    %149 = arith.mulf %146, %133 : vector<2x32xf32>
    %150 = arith.mulf %145, %147 : vector<2x32xf32>
    %151 = arith.addf %149, %150 : vector<2x32xf32>
    %152 = math.tanh %151 : vector<2x32xf32>
    %153 = arith.mulf %148, %152 : vector<2x32xf32>
    %cst_27 = arith.constant 0.000000e+00 : f32
    %154 = vector.broadcast %cst_27 : f32 to vector<2x32xf32>
    %155 = arith.maximumf %153, %154 : vector<2x32xf32>
    %156 = vector.broadcast %7 : vector<1x32xf32> to vector<2x32xf32>
    %157 = arith.mulf %155, %156 : vector<2x32xf32>
    %cst_28 = arith.constant dense<0.000000e+00> : vector<2xf32>
    %158 = vector.multi_reduction <add>, %157, %cst_28 [1] : vector<2x32xf32> to vector<2xf32>
    %159 = vector.shape_cast %158 : vector<2xf32> to vector<2x1xf32>
    %c0_29 = arith.constant 0 : index
    %160 = memref.load %arg5[%c0_29] : memref<1xf32, #tpu.memory_space<smem>>
    %161 = vector.broadcast %160 : f32 to vector<2x1xf32>
    %162 = arith.addf %159, %161 : vector<2x1xf32>
    %c0_30 = arith.constant 0 : index
    %c0_31 = arith.constant 0 : index
    %163 = vector.load %arg6[%c0_30, %c0_31] : memref<2x1xf32, #tpu.memory_space<vmem>>, vector<2x1xf32>
    tpu.vector_store %arg6[%c0_30, %c0_31], %162 {strides = array<i32>} : memref<2x1xf32, #tpu.memory_space<vmem>>, vector<2x1xf32>,
    return
  }
}

</mosaic_0001>

<bundles_post_ra>
// kernel: tpu_custom_call.1
= control target key start
LH: loop header
LB: loop body
LE: loop exit
PB: predicated region body
PF: predicated region fallthrough
CT: control target
= control target key end

     0   :  { %12 = vsyncpa [#allocation4], 0  ;;  %s1311_s21 = smov [#allocation3]   ;;  %s1492_s0 = inlined_call_operand.vmem [shape: f32[16,4], index: 0, kind: input, shape index: {}]   ;;  %s1493_s1 = inlined_call_operand.vmem [shape: f32[4,128], index: 1, kind: input, shape index: {}]   ;;  %s1494_s2 = inlined_call_operand.hbm [shape: f32[32,128], index: 2, kind: input, shape index: {}]   ;;  %s1495_s3 = inlined_call_operand.vmem [shape: f32[1,128], index: 3, kind: input, shape index: {}]   ;;  %s1496_s4 = inlined_call_operand.vmem [shape: f32[1,32], index: 4, kind: input, shape index: {}]   ;;  %s1497_s5 = inlined_call_operand.<no memory space> [shape: f32[1], index: 5, kind: input, shape index: {}]   ;;  %s1498_s6 = inlined_call_operand.vmem [shape: f32[2,1], index: 6, kind: output, shape index: {}]  }
   0x1   :  { %s22_s22 = sshll.u32 %s1311_s21, 4  ;;  %s1287_s25 = scalar_lea.hbm %s1494_s2, 512  ;;  %s23_s22 = int_to_ptr.vmem [resolvable:$true] %s22_s22 }
   0x2   :  { %p1288_p0 = scmp.ne.s32.totalorder %s1494_s2, %s1287_s25  ;;  %p1291_p1 = scmp.lt.u32.totalorder %s1287_s25, %s1494_s2 }
   0x4   :  { %p1293_p2 = pnand %p1291_p1, %p1288_p0 }
   0x6   :  { %1296 = shalt.err (!%p1293_p2)
}
   0x7   :  { %s1297_s30 = scalar_lea.vmem %s23_s22, 512  ;;  %p1302_p4 = scmp.lt.s32.totalorder %s23_s22, %s23_s22 }
   0x8   :  { %p1298_p3 = scmp.ne.s32.totalorder %s23_s22, %s1297_s30  ;;  %p1303_p5 = scmp.lt.s32.totalorder %s1297_s30, %s1297_s30 }
   0xa   :  { %p1304_p6 = por %p1303_p5, %p1302_p4 }
   0xc   :  { %p1305_p7 = pnand %p1304_p6, %p1298_p3 }
   0xe   :  { %1308 = shalt.err (!%p1305_p7)
}
   0xf   :  { %s1312_s7 = smov 128   ;;  %s1313_s8 = smov 8  }
  0x10   :  { %28 = dma.hbm_to_vmem [thread:$0]  %s1494_s2, 512, %s23_s22, [#allocation4], %s1312_s7, %s1312_s7, %s1313_s8  }
  0x11   :  { %1309 = dma.done.wait [#allocation4], 512  }
  0x12   :  { %1310 = vsyncadd [#allocation4], 4294966784  ;;  %v1314_v0 = vmov 0.0|0.0   ;;  %vm1315_vm0 = vmmov 0   ;;  %v1316_v1 = vmov 0.0   ;;  %vm55_vm1 = vcmask 1043456  }
  0x13   :  { %1166 = vmatprep.subr.bf16.mxu1 %v1314_v0  ;;  %1086 = vmatprep.mubr.msk.f32.mxu1 %vm1315_vm0, %v1316_v1  ;;  %vm48_vm2 = vcmask 31744   ;;  %v134_v2 = vld [vmem:[#allocation3] sm:$0xff]  ;;  %v135_v3 = vld [vmem:[#allocation3 + $0x8] sm:$0xff]  ;;  %v136_v8 = vld [vmem:[#allocation3 + $0x10] sm:$0xff]  ;;  %s1317_s16 = smov 64   ;;  %vm139_vm3 = vcmask 261120  }
  0x14   :  { %v40_v4 = vld [vmem:[%s1493_s1] sm:$0xf]  ;;  %v1373_v5 = vpack.c.bf16 %v135_v3, %v134_v2  ;;  %v39_v7 = vld [vmem:[%s1492_s0 + $0x8] sm:$0xff]  ;;  %v137_v9 = vld [vmem:[#allocation3 + $0x18] sm:$0xff]  ;;  %s1319_s19 = smov 96   ;;  %vm996_vm4 = vcmask 261126  }
  0x15   :  { %1073 = vmatprep.subr.msk.mxu0 %vm55_vm1, %v40_v4  ;;  %v38_v6 = vld [vmem:[%s1492_s0] sm:$0xff]  ;;  %v1382_v10 = vpack.c.bf16 %v137_v9, %v136_v8  ;;  %vm1003_vm5 = vcmask 7174  }
  0x16   :  { %1074 = vmatpush3.msk.msra.mxu0 %vm55_vm1, %v40_v4  ;;  %1075 = vmatprep.mubr.msk.f32.mxu0 %vm48_vm2, %v38_v6  ;;  %v1010_v11 = vld [vmem:[%s1495_s3] ss:$0 sm:$0xff]  ;;  %s1318_s3 = smov 32  }
  0x17   :  { %1168 = vmatpush3.bf16.msra.mxu1 %v1373_v5  ;;  %1076 = vmatmul.mubr.msk.f32.vlgmr.msra.gmra.mrb[0].mxu0 %vm48_vm2, %v39_v7 }
  0x18   :  { %1169 = vmatprep.subr.bf16.mxu1 %v1314_v0  ;;  %1172 = vmatprep.subr.bf16.mxu0 %v1314_v0 }
  0x19   :  { %1174 = vmatpush3.bf16.msra.mxu0 %v1373_v5  ;;  %1097 = vmatprep.mubr.msk.f32.mxu0 %vm1315_vm0, %v1316_v1 }
  0x1a   :  { %1175 = vmatprep.subr.bf16.mxu0 %v1314_v0 }
  0x1b   :  { %1171 = vmatpush3.bf16.msra.mxu1 %v1382_v10 }
  0x1c   :  { %1178 = vmatprep.subr.bf16.mxu1 %v1314_v0 }
  0x1d   :  { %1177 = vmatpush3.bf16.msra.mxu0 %v1382_v10 }
  0x1e   :  { %1087 = vmatmul.mubr.f32.vlgmr.msra.gmra.mrb[0].mxu1 %v1316_v1  ;;  %1184 = vmatprep.subr.bf16.mxu0 %v1314_v0 }
  0x1f   :  { %1180 = vmatpush3.bf16.msra.mxu1 %v1373_v5  ;;  %1108 = vmatprep.mubr.msk.f32.mxu1 %vm1315_vm0, %v1316_v1 }
  0x20   :  { %1181 = vmatprep.subr.bf16.mxu1 %v1314_v0 }
  0x23   :  { %1183 = vmatpush3.bf16.msra.mxu1 %v1382_v10 }
  0x24   :  { %1190 = vmatprep.subr.bf16.mxu1 %v1314_v0 }
  0xea   :  { %v1077_v12 = vpop.f32.mrb[0].mxu0 }
  0xeb   :  { %v1404_v13 = vadd.f32 %v1077_v12, %v1010_v11  ;;  %v125_v14 = vpop.f32.mrb[1].mxu0 }
  0xec   :  { %v1406_v15 = vadd.f32 %v1010_v11, %v125_v14 }
  0xf1   :  { %v209_v16 = vpop.f32.mrb[0].mxu1 }
  0xf2   :  { %v213_v17 = vadd.f32 %v209_v16, %v1406_v15  ;;  %v1088_v18 = vpop.f32.mrb[1].mxu1 }
  0xf4   :  { %1223 = vtanh.f32 %v213_v17  ;;  %v1014_v20 = vmul.f32 -1.442695, %v213_v17 }
  0xf6   :  { %1225 = vpow2.f32 %v1014_v20 }
  0xfe   :  { %v1224_v19 = vpop.eup %1223 }
  0xff   :  { %223 = vrot.lane.b32.xlu0 %v1224_v19, %s1317_s16 }
 0x100   :  { %v1226_v21 = vpop.eup %1225 }
 0x101   :  { %v217_v22 = vadd.f32 1.0, %v1226_v21 }
 0x103   :  { %1227 = vrcp.f32 %v217_v22 }
 0x10d   :  { %v1228_v23 = vpop.eup %1227 }
 0x10e   :  { %v221_v26 = vmul.f32 0.0, %v1228_v23 }
 0x171   :  { %v224_v24 = vpop.permute.xlu0 %223 }
 0x172   :  { %v226_v25 = vmul.f32 %v1228_v23, %v224_v24 }
 0x174   :  { %228 = vrot.lane.b32.xlu0 %v226_v25, %s1318_s3 }
 0x1e6   :  { %v229_v27 = vpop.permute.xlu0 %228 }
 0x1e7   :  { %v231_v28 = vadd.f32 %v229_v27, %v221_v26 }
 0x1e9   :  { %1229 = vtanh.f32 %v231_v28  ;;  %v325_v44 = vrot.slane %v231_v28, 6 }
 0x1f3   :  { %v1230_v29 = vpop.eup %1229 }
 0x1f4   :  { %234 = vrot.lane.b32.xlu1 %v1230_v29, %s1317_s16 }
 0x266   :  { %v235_v30 = vpop.permute.xlu1 %234 }
 0x267   :  { %v237_v31 = vmul.f32 %v1228_v23, %v235_v30 }
 0x269   :  { %239 = vrot.lane.b32.xlu1 %v237_v31, %s1318_s3 }
 0x2db   :  { %v240_v32 = vpop.permute.xlu1 %239 }
 0x2dc   :  { %1098 = vmatmul.mubr.msk.f32.vlgmr.msra.gmra.mrb[2].mxu0 %vm139_vm3, %v240_v32 }
 0x2dd   :  { %1186 = vmatpush3.bf16.msra.mxu0 %v1373_v5  ;;  %1119 = vmatprep.mubr.msk.f32.mxu0 %vm1315_vm0, %v1316_v1 }
 0x2de   :  { %1187 = vmatprep.subr.bf16.mxu0 %v1314_v0 }
 0x2e1   :  { %1189 = vmatpush3.bf16.msra.mxu0 %v1382_v10 }
 0x2e2   :  { %1196 = vmatprep.subr.bf16.mxu0 %v1314_v0 }
 0x3af   :  { %v309_v33 = vpop.f32.mrb[2].mxu0 }
 0x3b0   :  { %v314_v34 = vrot.slane %v309_v33, 6  ;;  %v1099_v35 = vpop.f32.mrb[3].mxu0 }
 0x3b2   :  { %v316_v36 = vadd.f32 %v314_v34, %v1406_v15 }
 0x3b4   :  { %1231 = vtanh.f32 %v316_v36  ;;  %v1016_v38 = vmul.f32 -1.442695, %v316_v36 }
 0x3b6   :  { %1233 = vpow2.f32 %v1016_v38 }
 0x3be   :  { %v1232_v37 = vpop.eup %1231 }
 0x3bf   :  { %329 = vrot.lane.b32.xlu0 %v1232_v37, %s1317_s16 }
 0x3c0   :  { %v1234_v39 = vpop.eup %1233 }
 0x3c1   :  { %v320_v40 = vadd.f32 1.0, %v1234_v39 }
 0x3c3   :  { %1235 = vrcp.f32 %v320_v40 }
 0x3cd   :  { %v1236_v41 = vpop.eup %1235 }
 0x3ce   :  { %v327_v45 = vmul.f32 %v1236_v41, %v325_v44 }
 0x431   :  { %v330_v42 = vpop.permute.xlu0 %329 }
 0x432   :  { %v332_v43 = vmul.f32 %v1236_v41, %v330_v42 }
 0x434   :  { %334 = vrot.lane.b32.xlu1 %v332_v43, %s1318_s3 }
 0x4a6   :  { %v335_v46 = vpop.permute.xlu1 %334 }
 0x4a7   :  { %v337_v47 = vadd.f32 %v335_v46, %v327_v45 }
 0x4a9   :  { %1237 = vtanh.f32 %v337_v47  ;;  %v432_v2 = vrot.slane %v337_v47, 6 }
 0x4b3   :  { %v1238_v48 = vpop.eup %1237 }
 0x4b4   :  { %340 = vrot.lane.b32.xlu0 %v1238_v48, %s1317_s16 }
 0x526   :  { %v341_v49 = vpop.permute.xlu0 %340 }
 0x527   :  { %v343_v50 = vmul.f32 %v1236_v41, %v341_v49 }
 0x529   :  { %v345_v51 = vrot.slane %v343_v50, 2 }
 0x52b   :  { %346 = vrot.lane.b32.xlu1 %v345_v51, %s1318_s3 }
 0x59d   :  { %v347_v52 = vpop.permute.xlu1 %346 }
 0x59e   :  { %1109 = vmatmul.mubr.msk.f32.vlgmr.msra.gmra.mrb[2].mxu1 %vm139_vm3, %v347_v52 }
 0x59f   :  { %1192 = vmatpush3.bf16.msra.mxu1 %v1373_v5  ;;  %1130 = vmatprep.mubr.msk.f32.mxu1 %vm1315_vm0, %v1316_v1 }
 0x5a0   :  { %1193 = vmatprep.subr.bf16.mxu1 %v1314_v0 }
 0x5a3   :  { %1195 = vmatpush3.bf16.msra.mxu1 %v1382_v10 }
 0x5a4   :  { %1202 = vmatprep.subr.bf16.mxu1 %v1314_v0 }
 0x671   :  { %v416_v53 = vpop.f32.mrb[2].mxu1 }
 0x672   :  { %v421_v54 = vrot.slane %v416_v53, 4  ;;  %v1110_v55 = vpop.f32.mrb[3].mxu1 }
 0x674   :  { %v423_v56 = vadd.f32 %v421_v54, %v1406_v15 }
 0x676   :  { %1239 = vtanh.f32 %v423_v56  ;;  %v1018_v58 = vmul.f32 -1.442695, %v423_v56 }
 0x678   :  { %1241 = vpow2.f32 %v1018_v58 }
 0x680   :  { %v1240_v57 = vpop.eup %1239 }
 0x681   :  { %436 = vrot.lane.b32.xlu0 %v1240_v57, %s1317_s16 }
 0x682   :  { %v1242_v59 = vpop.eup %1241 }
 0x683   :  { %v427_v60 = vadd.f32 1.0, %v1242_v59 }
 0x685   :  { %1243 = vrcp.f32 %v427_v60 }
 0x68f   :  { %v1244_v61 = vpop.eup %1243 }
 0x690   :  { %v434_v3 = vmul.f32 %v1244_v61, %v432_v2 }
 0x6f3   :  { %v437_v62 = vpop.permute.xlu0 %436 }
 0x6f4   :  { %v439_v63 = vmul.f32 %v1244_v61, %v437_v62 }
 0x6f6   :  { %441 = vrot.lane.b32.xlu1 %v439_v63, %s1318_s3 }
 0x768   :  { %v442_v4 = vpop.permute.xlu1 %441 }
 0x769   :  { %v444_v6 = vadd.f32 %v442_v4, %v434_v3 }
 0x76b   :  { %1245 = vtanh.f32 %v444_v6  ;;  %v539_v26 = vrot.slane %v444_v6, 6 }
 0x775   :  { %v1246_v7 = vpop.eup %1245 }
 0x776   :  { %447 = vrot.lane.b32.xlu0 %v1246_v7, %s1317_s16 }
 0x7e8   :  { %v448_v8 = vpop.permute.xlu0 %447 }
 0x7e9   :  { %v450_v9 = vmul.f32 %v1244_v61, %v448_v8 }
 0x7eb   :  { %v452_v11 = vrot.slane %v450_v9, 4 }
 0x7ed   :  { %453 = vrot.lane.b32.xlu1 %v452_v11, %s1318_s3 }
 0x85f   :  { %v454_v12 = vpop.permute.xlu1 %453 }
 0x860   :  { %1120 = vmatmul.mubr.msk.f32.vlgmr.msra.gmra.mrb[4].mxu0 %vm139_vm3, %v454_v12 }
 0x861   :  { %1198 = vmatpush3.bf16.msra.mxu0 %v1373_v5  ;;  %1141 = vmatprep.mubr.msk.f32.mxu0 %vm1315_vm0, %v1316_v1 }
 0x862   :  { %1199 = vmatprep.subr.bf16.mxu0 %v1314_v0 }
 0x865   :  { %1201 = vmatpush3.bf16.msra.mxu0 %v1382_v10 }
 0x866   :  { %1208 = vmatprep.subr.bf16.mxu0 %v1314_v0 }
 0x933   :  { %v523_v14 = vpop.f32.mrb[4].mxu0 }
 0x934   :  { %v528_v16 = vrot.slane %v523_v14, 2  ;;  %v1121_v17 = vpop.f32.mrb[5].mxu0 }
 0x936   :  { %v530_v18 = vadd.f32 %v528_v16, %v1406_v15 }
 0x938   :  { %1247 = vtanh.f32 %v530_v18  ;;  %v1020_v20 = vmul.f32 -1.442695, %v530_v18 }
 0x93a   :  { %1249 = vpow2.f32 %v1020_v20 }
 0x942   :  { %v1248_v19 = vpop.eup %1247 }
 0x943   :  { %543 = vrot.lane.b32.xlu0 %v1248_v19, %s1317_s16 }
 0x944   :  { %v1250_v21 = vpop.eup %1249 }
 0x945   :  { %v534_v22 = vadd.f32 1.0, %v1250_v21 }
 0x947   :  { %1251 = vrcp.f32 %v534_v22 }
 0x951   :  { %v1252_v23 = vpop.eup %1251 }
 0x952   :  { %v541_v27 = vmul.f32 %v1252_v23, %v539_v26 }
 0x9b5   :  { %v544_v24 = vpop.permute.xlu0 %543 }
 0x9b6   :  { %v546_v25 = vmul.f32 %v1252_v23, %v544_v24 }
 0x9b8   :  { %548 = vrot.lane.b32.xlu1 %v546_v25, %s1318_s3 }
 0xa2a   :  { %v549_v28 = vpop.permute.xlu1 %548 }
 0xa2b   :  { %v551_v29 = vadd.f32 %v549_v28, %v541_v27 }
 0xa2d   :  { %1253 = vtanh.f32 %v551_v29  ;;  %v643_v44 = vrot.slane %v551_v29, 6 }
 0xa37   :  { %v1254_v15 = vpop.eup %1253 }
 0xa38   :  { %554 = vrot.lane.b32.xlu0 %v1254_v15, %s1317_s16 }
 0xaaa   :  { %v555_v30 = vpop.permute.xlu0 %554 }
 0xaab   :  { %v557_v31 = vmul.f32 %v1252_v23, %v555_v30 }
 0xaad   :  { %v559_v32 = vrot.slane %v557_v31, 6 }
 0xaaf   :  { %560 = vrot.lane.b32.xlu1 %v559_v32, %s1318_s3 }
 0xb21   :  { %v561_v33 = vpop.permute.xlu1 %560 }
 0xb22   :  { %1131 = vmatmul.mubr.msk.f32.vlgmr.msra.gmra.mrb[4].mxu1 %vm139_vm3, %v561_v33 }
 0xb23   :  { %1204 = vmatpush3.bf16.msra.mxu1 %v1373_v5  ;;  %1152 = vmatprep.mubr.msk.f32.mxu1 %vm1315_vm0, %v1316_v1 }
 0xb24   :  { %1205 = vmatprep.subr.bf16.mxu1 %v1314_v0 }
 0xb27   :  { %1207 = vmatpush3.bf16.msra.mxu1 %v1382_v10 }
 0xbf5   :  { %v630_v34 = vpop.f32.mrb[4].mxu1 }
 0xbf6   :  { %v634_v35 = vadd.f32 %v630_v34, %v1404_v13  ;;  %v1132_v36 = vpop.f32.mrb[5].mxu1 }
 0xbf8   :  { %1255 = vtanh.f32 %v634_v35  ;;  %v1022_v38 = vmul.f32 -1.442695, %v634_v35 }
 0xbfa   :  { %1257 = vpow2.f32 %v1022_v38 }
 0xc02   :  { %v1256_v37 = vpop.eup %1255 }
 0xc03   :  { %647 = vrot.lane.b32.xlu0 %v1256_v37, %s1317_s16 }
 0xc04   :  { %v1258_v39 = vpop.eup %1257 }
 0xc05   :  { %v638_v40 = vadd.f32 1.0, %v1258_v39 }
 0xc07   :  { %1259 = vrcp.f32 %v638_v40  ;;  %v1029_v40 = vld [vmem:[%s1496_s4] ss:$0 sm:$0xff] }
 0xc11   :  { %v1260_v41 = vpop.eup %1259 }
 0xc12   :  { %v645_v45 = vmul.f32 %v1260_v41, %v643_v44 }
 0xc75   :  { %v648_v42 = vpop.permute.xlu0 %647 }
 0xc76   :  { %v650_v43 = vmul.f32 %v1260_v41, %v648_v42 }
 0xc78   :  { %652 = vrot.lane.b32.xlu1 %v650_v43, %s1318_s3 }
 0xcea   :  { %v653_v46 = vpop.permute.xlu1 %652 }
 0xceb   :  { %v655_v47 = vadd.f32 %v653_v46, %v645_v45 }
 0xced   :  { %1261 = vtanh.f32 %v655_v47 }
 0xcf7   :  { %v1262_v48 = vpop.eup %1261 }
 0xcf8   :  { %658 = vrot.lane.b32.xlu0 %v1262_v48, %s1317_s16 }
 0xd6a   :  { %v659_v49 = vpop.permute.xlu0 %658 }
 0xd6b   :  { %v661_v50 = vmul.f32 %v1260_v41, %v659_v49 }
 0xd6d   :  { %663 = vrot.lane.b32.xlu1 %v661_v50, %s1318_s3 }
 0xddf   :  { %v664_v51 = vpop.permute.xlu1 %663 }
 0xde0   :  { %1142 = vmatmul.mubr.msk.f32.vlgmr.msra.gmra.mrb[6].mxu0 %vm139_vm3, %v664_v51 }
 0xde1   :  { %1210 = vmatpush3.bf16.msra.mxu0 %v1373_v5  ;;  %1163 = vmatprep.mubr.msk.f32.mxu0 %vm1315_vm0, %v1316_v1 }
 0xde2   :  { %1211 = vmatprep.subr.bf16.mxu0 %v1314_v0  ;;  %v749_v0 = vrot.slane %v655_v47, 6 }
 0xde5   :  { %1213 = vmatpush3.bf16.msra.mxu0 %v1382_v10 }
 0xeb3   :  { %v733_v52 = vpop.f32.mrb[6].mxu0 }
 0xeb4   :  { %v738_v53 = vrot.slane %v733_v52, 6  ;;  %v1143_v54 = vpop.f32.mrb[7].mxu0  ;;  %v1001_v52 = vstv %s1497_s5 }
 0xeb6   :  { %v740_v55 = vadd.f32 %v738_v53, %v1404_v13 }
 0xeb8   :  { %1263 = vtanh.f32 %v740_v55  ;;  %v1024_v57 = vmul.f32 -1.442695, %v740_v55 }
 0xeba   :  { %1265 = vpow2.f32 %v1024_v57 }
 0xec2   :  { %v1264_v56 = vpop.eup %1263 }
 0xec3   :  { %753 = vrot.lane.b32.xlu0 %v1264_v56, %s1317_s16 }
 0xec4   :  { %v1266_v58 = vpop.eup %1265 }
 0xec5   :  { %v744_v5 = vadd.f32 1.0, %v1266_v58 }
 0xec7   :  { %1267 = vrcp.f32 %v744_v5 }
 0xed1   :  { %v1268_v59 = vpop.eup %1267 }
 0xed2   :  { %v751_v10 = vmul.f32 %v1268_v59, %v749_v0 }
 0xf35   :  { %v754_v1 = vpop.permute.xlu0 %753 }
 0xf36   :  { %v756_v60 = vmul.f32 %v1268_v59, %v754_v1 }
 0xf38   :  { %758 = vrot.lane.b32.xlu1 %v756_v60, %s1318_s3 }
 0xfaa   :  { %v759_v61 = vpop.permute.xlu1 %758 }
 0xfab   :  { %v761_v62 = vadd.f32 %v759_v61, %v751_v10 }
 0xfad   :  { %1269 = vtanh.f32 %v761_v62  ;;  %v856_v21 = vrot.slane %v761_v62, 6 }
 0xfb7   :  { %v1270_v63 = vpop.eup %1269 }
 0xfb8   :  { %764 = vrot.lane.b32.xlu0 %v1270_v63, %s1317_s16 }
0x102a   :  { %v765_v2 = vpop.permute.xlu0 %764 }
0x102b   :  { %v767_v3 = vmul.f32 %v1268_v59, %v765_v2 }
0x102d   :  { %v769_v4 = vrot.slane %v767_v3, 2 }
0x102f   :  { %770 = vrot.lane.b32.xlu1 %v769_v4, %s1318_s3 }
0x10a1   :  { %v771_v6 = vpop.permute.xlu1 %770 }
0x10a2   :  { %1153 = vmatmul.mubr.msk.f32.vlgmr.msra.gmra.mrb[6].mxu1 %vm139_vm3, %v771_v6 }
0x1175   :  { %v840_v7 = vpop.f32.mrb[6].mxu1 }
0x1176   :  { %v845_v8 = vrot.slane %v840_v7, 4  ;;  %v1154_v9 = vpop.f32.mrb[7].mxu1 }
0x1178   :  { %v847_v11 = vadd.f32 %v845_v8, %v1404_v13 }
0x117a   :  { %1271 = vtanh.f32 %v847_v11  ;;  %v1026_v14 = vmul.f32 -1.442695, %v847_v11 }
0x117c   :  { %1273 = vpow2.f32 %v1026_v14 }
0x1184   :  { %v1272_v12 = vpop.eup %1271 }
0x1185   :  { %860 = vrot.lane.b32.xlu0 %v1272_v12, %s1317_s16 }
0x1186   :  { %v1274_v16 = vpop.eup %1273 }
0x1187   :  { %v851_v17 = vadd.f32 1.0, %v1274_v16 }
0x1189   :  { %1275 = vrcp.f32 %v851_v17 }
0x1193   :  { %v1276_v18 = vpop.eup %1275 }
0x1194   :  { %v858_v22 = vmul.f32 %v1276_v18, %v856_v21 }
0x11f7   :  { %v861_v19 = vpop.permute.xlu0 %860 }
0x11f8   :  { %v863_v20 = vmul.f32 %v1276_v18, %v861_v19 }
0x11fa   :  { %865 = vrot.lane.b32.xlu1 %v863_v20, %s1318_s3 }
0x126c   :  { %v866_v23 = vpop.permute.xlu1 %865 }
0x126d   :  { %v868_v24 = vadd.f32 %v866_v23, %v858_v22 }
0x126f   :  { %1277 = vtanh.f32 %v868_v24 }
0x1279   :  { %v1278_v25 = vpop.eup %1277 }
0x127a   :  { %871 = vrot.lane.b32.xlu0 %v1278_v25, %s1317_s16 }
0x12ec   :  { %v872_v26 = vpop.permute.xlu0 %871 }
0x12ed   :  { %v874_v27 = vmul.f32 %v1276_v18, %v872_v26 }
0x12ef   :  { %v876_v28 = vrot.slane %v874_v27, 4 }
0x12f1   :  { %877 = vrot.lane.b32.xlu1 %v876_v28, %s1318_s3 }
0x1363   :  { %v878_v29 = vpop.permute.xlu1 %877 }
0x1364   :  { %1164 = vmatmul.mubr.msk.f32.vlgmr.msra.gmra.mrb[8].mxu0 %vm139_vm3, %v878_v29 }
0x1437   :  { %v947_v15 = vpop.f32.mrb[8].mxu0 }
0x1438   :  { %v952_v30 = vrot.slane %v947_v15, 2  ;;  %v1165_v31 = vpop.f32.mrb[9].mxu0 }
0x143a   :  { %v954_v32 = vadd.f32 %v952_v30, %v1404_v13  ;;  %v963_v13 = vrot.slane %v868_v24, 6 }
0x143c   :  { %1279 = vtanh.f32 %v954_v32  ;;  %v1028_v34 = vmul.f32 -1.442695, %v954_v32 }
0x143e   :  { %1281 = vpow2.f32 %v1028_v34 }
0x1446   :  { %v1280_v33 = vpop.eup %1279 }
0x1447   :  { %967 = vrot.lane.b32.xlu0 %v1280_v33, %s1317_s16 }
0x1448   :  { %v1282_v35 = vpop.eup %1281 }
0x1449   :  { %v958_v36 = vadd.f32 1.0, %v1282_v35 }
0x144b   :  { %1283 = vrcp.f32 %v958_v36 }
0x1455   :  { %v1284_v37 = vpop.eup %1283 }
0x1456   :  { %v965_v41 = vmul.f32 %v1284_v37, %v963_v13 }
0x14b9   :  { %v968_v38 = vpop.permute.xlu0 %967 }
0x14ba   :  { %v970_v39 = vmul.f32 %v1284_v37, %v968_v38 }
0x14bc   :  { %972 = vrot.lane.b32.xlu1 %v970_v39, %s1318_s3 }
0x14c0   :  { %988 = vrot.lane.b32.xlu1 %v1029_v40, %s1319_s19 }
0x152e   :  { %v973_v42 = vpop.permute.xlu1 %972 }
0x152f   :  { %v975_v43 = vadd.f32 %v973_v42, %v965_v41 }
0x1531   :  { %1285 = vtanh.f32 %v975_v43 }
0x1532   :  { %v989_v47 = vpop.permute.xlu1 %988 }
0x153b   :  { %v1286_v44 = vpop.eup %1285 }
0x153c   :  { %978 = vrot.lane.b32.xlu0 %v1286_v44, %s1317_s16 }
0x15ae   :  { %v979_v45 = vpop.permute.xlu0 %978 }
0x15af   :  { %v981_v46 = vmul.f32 %v1284_v37, %v979_v45 }
0x15b1   :  { %v982_v48 = vmax.f32 %v981_v46, 0.0 }
0x15b3   :  { %v991_v49 = vmul.f32 %v989_v47, %v982_v48 }
0x15b5   :  { %993 = vrot.lane.b32.xlu0 %v991_v49, %s1318_s3 }
0x1627   :  { %v994_v50 = vpop.permute.xlu0 %993 }
0x1628   :  { %v997_v51 = vsel %vm996_vm4, %v994_v50, 0.0 }
0x1629   :  { %998 = vadd.xlane.f32.xlu1 %v997_v51 }
0x16b6   :  { %v999_v53 = vpop.xlane.xlu1 %998 }
0x16b7   :  { %v1002_v54 = vadd.f32 %v1001_v52, %v999_v53 }
0x16b9   :  { %1004 = vst.msk [vmem:[%s1498_s6 - $0x6] sm:$0xc0] %vm1003_vm5, %v1002_v54 }
0x16ba   :  { %1009 = vsyncpa [#allocation4], 1 }

</bundles_post_ra>
